<compile_context>
chip_gen: v7x
topology: tpu7x:2x2x1
jax: 0.10.0
libtpu: 0.0.40
codegen_flags: <defaults>
</compile_context>

<pallas_src>
import jax
import jax.numpy as jnp
from jax.experimental import pallas as pl
from jax.experimental.pallas import tpu as pltpu


def _make_kernel(hw: int):
    inv_hw = 1.0 / float(hw)

    def kernel(x_ref, w1t_ref, w2t_ref, o_ref):
        # x_ref: (bt, C, HW) native dtype
        # w1t_ref: (C, Cr) = fc1.weight.T ;  w2t_ref: (Cr, C) = fc2.weight.T
        x = x_ref[...]
        bt = x.shape[0]

        # Adaptive avg / max pool to 1x1 over the lane (spatial) axis.
        # f32 accumulation; no padding so no masking is needed.
        avg = jnp.sum(x, axis=-1, dtype=jnp.float32) * inv_hw      # (bt, C)
        mx = jnp.max(x, axis=-1).astype(jnp.float32)               # (bt, C)

        # Shared MLP (Linear -> ReLU -> Linear, no bias) applied to the avg
        # and max pooled vectors of all bt images in one fused matmul pair.
        pooled = jnp.concatenate([avg, mx], axis=0)                # (2*bt, C)
        h = jnp.maximum(
            jnp.dot(pooled, w1t_ref[...], preferred_element_type=jnp.float32),
            0.0)                                                   # (2*bt, Cr)
        o = jnp.dot(h, w2t_ref[...], preferred_element_type=jnp.float32)

        att = jax.nn.sigmoid(o[:bt] + o[bt:])                      # (bt, C) f32

        # Channel-wise scale in the native dtype (no full-block f32 temp).
        o_ref[...] = x * att.astype(x.dtype)[:, :, None]

    return kernel


def channel_attention(x, w1, w2):
    """x: (B, C, H, W); w1 = fc1.weight (C//r, C); w2 = fc2.weight (C, C//r)."""
    B, C, H, W = x.shape
    Cr = w1.shape[0]
    HW = H * W

    # No padding: last two block dims equal the full (C, HW) extents.
    x3 = x.reshape(B, C, HW)

    itemsize = jnp.dtype(x.dtype).itemsize
    per_image_bytes = C * HW * itemsize
    weight_bytes = 2 * C * Cr * 4

    # Generation-aware sizing.
    try:
        vmem_cap = int(pltpu.get_tpu_info().vmem_capacity_bytes)
    except Exception:  # pragma: no cover - conservative fallback
        vmem_cap = 64 << 20
    if vmem_cap >= (100 << 20):        # v5e / v6e: 128 MiB VMEM
        vmem_clamp = 96 << 20
        target_block_bytes = 8 << 20
    else:                              # v7x: 64 MiB VMEM per TensorCore
        vmem_clamp = 40 << 20
        target_block_bytes = 3 << 20

    # Budget: double-buffered input + output blocks (4x) plus ~2 blocks of
    # in-kernel temporaries/slack plus the (small, buffered) weights.
    slack = 2 << 20
    max_block_bytes = max(per_image_bytes,
                          (vmem_clamp - 4 * weight_bytes - slack) // 6)
    block_budget = min(target_block_bytes, max_block_bytes)

    bt = max(1, min(B, block_budget // max(per_image_bytes, 1)))
    if B >= 2:
        # Keep grid >= 2 so both v7x TensorCores get work and the pipeline
        # always has a block to overlap.
        bt = min(bt, -(-B // 2))
    grid = (pl.cdiv(B, bt),)  # ragged final block: Pallas masks its stores
    # TODO(synk): a single image larger than the VMEM budget needs a split
    # pool+MLP kernel followed by a tiled elementwise-scale kernel.

    block_bytes = bt * per_image_bytes
    vmem_need = 6 * block_bytes + 4 * weight_bytes + slack
    vmem_limit = int(min(max(vmem_need, 16 << 20), vmem_clamp))

    cost = pl.CostEstimate(
        flops=int(3 * B * C * HW + 8 * B * C * Cr),
        transcendentals=int(B * C),
        bytes_accessed=int(2 * B * C * HW * itemsize + weight_bytes),
    )

    out = pl.pallas_call(
        _make_kernel(HW),
        out_shape=jax.ShapeDtypeStruct((B, C, HW), x.dtype),
        grid=grid,
        in_specs=[
            pl.BlockSpec((bt, C, HW), lambda b: (b, 0, 0)),
            pl.BlockSpec((C, Cr), lambda b: (0, 0)),
            pl.BlockSpec((Cr, C), lambda b: (0, 0)),
        ],
        out_specs=pl.BlockSpec((bt, C, HW), lambda b: (b, 0, 0)),
        compiler_params=pltpu.CompilerParams(
            dimension_semantics=("parallel",),
            vmem_limit_bytes=vmem_limit,
        ),
        cost_estimate=cost,
    )(x3, w1.T, w2.T)

    return out.reshape(B, C, H, W)


def reference(x, w1, w2):
    avg = jnp.mean(x, axis=(2, 3))                      # (B, C)
    mx = jnp.max(x, axis=(2, 3))                        # (B, C)

    def mlp(v):
        return jnp.maximum(v @ w1.T, 0.0) @ w2.T

    att = jax.nn.sigmoid(mlp(avg) + mlp(mx))            # (B, C)
    return x * att[:, :, None, None]


if __name__ == "__main__":
    B, C = 2, 32
    reduction_ratio = 16
    Cr = C // reduction_ratio                           # 2

    key = jax.random.PRNGKey(0)
    kx, k1, k2, kx2 = jax.random.split(key, 4)

    # Deterministic init mimicking nn.Linear default (uniform +/- 1/sqrt(fan_in))
    b1 = 1.0 / jnp.sqrt(jnp.float32(C))
    b2 = 1.0 / jnp.sqrt(jnp.float32(Cr))
    w1 = jax.random.uniform(k1, (Cr, C), jnp.float32, -b1, b1)   # fc1.weight
    w2 = jax.random.uniform(k2, (C, Cr), jnp.float32, -b2, b2)   # fc2.weight

    # Case 1: lane-aligned spatial extent (HW = 256).
    H = W = 16
    x = jax.random.normal(kx, (B, C, H, W), dtype=jnp.float32)
    out = jax.block_until_ready(channel_attention(x, w1, w2))
    ref = reference(x, w1, w2)
    assert out.shape == (B, C, H, W)
    assert jnp.allclose(out, ref, atol=1e-5, rtol=1e-5), \
        float(jnp.max(jnp.abs(out - ref)))

    # Case 2: unaligned spatial extent (HW = 100) -> ragged lane group, no pad.
    H2 = W2 = 10
    x2 = jax.random.normal(kx2, (B, C, H2, W2), dtype=jnp.float32)
    out2 = jax.block_until_ready(channel_attention(x2, w1, w2))
    ref2 = reference(x2, w1, w2)
    assert out2.shape == (B, C, H2, W2)
    assert jnp.allclose(out2, ref2, atol=1e-5, rtol=1e-5), \
        float(jnp.max(jnp.abs(out2 - ref2)))

    print("KERNEL_OK")
</pallas_src>

<mosaic_0001>
module attributes {stable_mosaic.version = 11 : i64} {
  func.func @kernel(%arg0: i32, %arg1: memref<1x32x256xf32, #tpu.memory_space<vmem>>, %arg2: memref<32x2xf32, #tpu.memory_space<vmem>>, %arg3: memref<2x32xf32, #tpu.memory_space<vmem>>, %arg4: memref<1x32x256xf32, #tpu.memory_space<vmem>>) attributes {dimension_semantics = [#tpu.dimension_semantics<parallel>], iteration_bounds = array<i64: 2>, scalar_prefetch = 0 : i64, scratch_operands = 0 : i64, tpu.core_type = #tpu.core_type<tc>, window_params = [{transform_indices = @transform_0, window_bounds = array<i64: 1, 32, 256>}, {pipeline_mode = #tpu.pipeline_mode<synchronous>, transform_indices = @transform_1, window_bounds = array<i64: 32, 2>}, {pipeline_mode = #tpu.pipeline_mode<synchronous>, transform_indices = @transform_2, window_bounds = array<i64: 2, 32>}, {transform_indices = @transform_3, window_bounds = array<i64: 1, 32, 256>}]} {
    %c0 = arith.constant 0 : index
    %c0_0 = arith.constant 0 : index
    %c0_1 = arith.constant 0 : index
    %0 = vector.load %arg1[%c0, %c0_0, %c0_1] : memref<1x32x256xf32, #tpu.memory_space<vmem>>, vector<1x32x256xf32>
    %cst = arith.constant dense<0.000000e+00> : vector<1x32xf32>
    %1 = vector.multi_reduction <add>, %0, %cst [2] : vector<1x32x256xf32> to vector<1x32xf32>
    %cst_2 = arith.constant 3.906250e-03 : f32
    %2 = vector.broadcast %cst_2 : f32 to vector<1x32xf32>
    %3 = arith.mulf %1, %2 : vector<1x32xf32>
    %cst_3 = arith.constant dense<0xFF800000> : vector<1x32xf32>
    %4 = vector.multi_reduction <maximumf>, %0, %cst_3 [2] : vector<1x32x256xf32> to vector<1x32xf32>
    %5 = tpu.concatenate %3, %4 in 0 : vector<1x32xf32>, vector<1x32xf32> -> vector<2x32xf32>
    %c0_4 = arith.constant 0 : index
    %c0_5 = arith.constant 0 : index
    %6 = vector.load %arg2[%c0_4, %c0_5] : memref<32x2xf32, #tpu.memory_space<vmem>>, vector<32x2xf32>
    %cst_6 = arith.constant dense<0.000000e+00> : vector<2x2xf32>
    %7 = tpu.matmul %5, %6, %cst_6 {dimension_numbers = #tpu.dot_dimension_numbers<[1], [0], [0], [1], [0, 0, 1, 1], [], []>} : vector<2x32xf32>, vector<32x2xf32>, vector<2x2xf32> -> vector<2x2xf32>
    %cst_7 = arith.constant 0.000000e+00 : f32
    %8 = vector.broadcast %cst_7 : f32 to vector<2x2xf32>
    %9 = arith.maximumf %7, %8 : vector<2x2xf32>
    %c0_8 = arith.constant 0 : index
    %c0_9 = arith.constant 0 : index
    %10 = vector.load %arg3[%c0_8, %c0_9] : memref<2x32xf32, #tpu.memory_space<vmem>>, vector<2x32xf32>
    %cst_10 = arith.constant dense<0.000000e+00> : vector<2x32xf32>
    %11 = tpu.matmul %9, %10, %cst_10 {dimension_numbers = #tpu.dot_dimension_numbers<[1], [0], [0], [1], [0, 0, 1, 1], [], []>} : vector<2x2xf32>, vector<2x32xf32>, vector<2x32xf32> -> vector<2x32xf32>
    %12 = vector.extract_strided_slice %11 {offsets = [0, 0], sizes = [1, 32], strides = [1, 1]} : vector<2x32xf32> to vector<1x32xf32>
    %13 = vector.extract_strided_slice %11 {offsets = [1, 0], sizes = [1, 32], strides = [1, 1]} : vector<2x32xf32> to vector<1x32xf32>
    %14 = arith.addf %12, %13 : vector<1x32xf32>
    %15 = arith.negf %14 : vector<1x32xf32>
    %16 = math.exp %15 : vector<1x32xf32>
    %cst_11 = arith.constant 1.000000e+00 : f32
    %17 = vector.broadcast %cst_11 : f32 to vector<1x32xf32>
    %18 = arith.addf %17, %16 : vector<1x32xf32>
    %19 = arith.divf %17, %18 : vector<1x32xf32>
    %20 = vector.shape_cast %19 : vector<1x32xf32> to vector<1x32x1xf32>
    %21 = vector.broadcast %20 : vector<1x32x1xf32> to vector<1x32x256xf32>
    %22 = arith.mulf %0, %21 : vector<1x32x256xf32>
    %c0_12 = arith.constant 0 : index
    %c0_13 = arith.constant 0 : index
    %c0_14 = arith.constant 0 : index
    %23 = vector.load %arg4[%c0_12, %c0_13, %c0_14] : memref<1x32x256xf32, #tpu.memory_space<vmem>>, vector<1x32x256xf32>
    tpu.vector_store %arg4[%c0_12, %c0_13, %c0_14], %22 {strides = array<i32>} : memref<1x32x256xf32, #tpu.memory_space<vmem>>, vector<1x32x256xf32>,
    return
  }
  func.func @transform_0(%arg0: i32) -> (i32, i32, i32) {
    %c0_i32 = arith.constant 0 : i32
    %c0_i32_0 = arith.constant 0 : i32
    %c0_i32_1 = arith.constant 0 : i32
    return %arg0, %c0_i32, %c0_i32_0 : i32, i32, i32
  }
  func.func @transform_1(%arg0: i32) -> (i32, i32) {
    %c0_i32 = arith.constant 0 : i32
    %c0_i32_0 = arith.constant 0 : i32
    %c0_i32_1 = arith.constant 0 : i32
    return %c0_i32, %c0_i32_0 : i32, i32
  }
  func.func @transform_2(%arg0: i32) -> (i32, i32) {
    %c0_i32 = arith.constant 0 : i32
    %c0_i32_0 = arith.constant 0 : i32
    %c0_i32_1 = arith.constant 0 : i32
    return %c0_i32, %c0_i32_0 : i32, i32
  }
  func.func @transform_3(%arg0: i32) -> (i32, i32, i32) {
    %c0_i32 = arith.constant 0 : i32
    %c0_i32_0 = arith.constant 0 : i32
    %c0_i32_1 = arith.constant 0 : i32
    return %arg0, %c0_i32, %c0_i32_0 : i32, i32, i32
  }
}

</mosaic_0001>

<bundles_post_ra>
// kernel: tpu_custom_call.1
= control target key start
LH: loop header
LB: loop body
LE: loop exit
PB: predicated region body
PF: predicated region fallthrough
CT: control target
= control target key end

     0   :  { %8 = vsyncpa [#allocation3], 0  ;;  %s1029_s0 = inlined_call_operand.hbm [shape: f32[2,32,256], index: 0, kind: input, shape index: {}]   ;;  %s1030_s1 = inlined_call_operand.vmem [shape: f32[32,2], index: 1, kind: input, shape index: {}]   ;;  %s1031_s2 = inlined_call_operand.vmem [shape: f32[2,32], index: 2, kind: input, shape index: {}]   ;;  %s1032_s3 = inlined_call_operand.hbm [shape: f32[2,32,256], index: 3, kind: output, shape index: {}]  }
   0x1   :  { %10 = vsyncpa [#allocation3 + $0x1], 0 }
   0x2   :  { %11 = vsyncpa [#allocation4], 0 }
   0x3   :  { %13 = vsyncpa [#allocation4 + $0x1], 0  ;;  %s806_s12 = smov 0   ;;  %s808_s13 = smov 0  }
   0x4   :  { %s810_s14 = smov 0   ;;  %s812_s15 = smov 0  }
   0x5 LB: > { %s827_s16 = sadd.s32 4294967295, %s775_s15   ;;  %s573_s17 = sadd.s32 4294967294, %s775_s15   ;;  %s775_s15 = sphi %s812_s15, %s1045_s15   ;;  %s771_s14 = sphi %s810_s14, %s1044_s14   ;;  %s767_s13 = sphi %s808_s13, %s1043_s13   ;;  %s763_s12 = sphi %s806_s12, %s1042_s12  }
   0x6   : > { %s831_s18 = sadd.s32 1, %s775_s15   ;;  %s26_s19 = sadd.s32 1, %s771_s14 }
   0x7   : > { %s23_s20 = ssub.s32 %s775_s15, %s831_s18  ;;  %p33_p0 = scmp.ne.s32.totalorder %s771_s14, %s767_s13 }
   0x8   : > { %p24_p1 = scmp.eq.s32.totalorder %s23_s20, 0  ;;  %p34_p2 = scmp.eq.s32.totalorder %s775_s15, 0 }
   0x9   : > { %p39_p3 = scmp.ne.s32.totalorder %s767_s13, %s763_s12  ;;  %p40_p4 = scmp.eq.s32.totalorder %s827_s16, 0 }
   0xa   : > { %s843_s21 = scalar_select %p24_p1, %s771_s14, %s26_s19  }
   0xb   : > { %p845_p5 = por %p34_p2, %p33_p0  ;;  %p849_p6 = por %p40_p4, %p39_p3 }
   0xc   : > { %p105_p7 = scmp.eq.s32.totalorder %s827_s16, 1  ;;  %p111_p8 = scmp.eq.s32.totalorder %s573_s17, 1 }
   0xd   : > { %p634_p10 = scmp.lt.s32.totalorder %s775_s15, 2  ;;  %s137_s26 = sand.u32 1, %s771_s14  }
   0xe   : > { %p856_p11 = por %p105_p7, %p33_p0  ;;  %p860_p12 = por %p111_p8, %p39_p3 }
   0xf   : > { %s591_s27 = sshll.u32 %s775_s15, 10  ;;  %s576_s28 = sshll.u32 %s137_s26, 6 }
  0x10   : > { %s1036_s24 = scalar_select %p856_p11, 1, 0 }
  0x11   : > { %s1037_s25 = scalar_select %p860_p12, 1, 0 }
  0x12   : > { %s869_s4 = scalar_lea.hbm %s1029_s0, %s591_s27  ;;  %s141_s5 = scalar_lea.vmem [#allocation2], %s576_s28 }
  0x13   : > { %s148_s6 = sshll.u32 %s141_s5, 4  ;;  %p873_p13 = pnand %p634_p10, %p845_p5  ;;  %s877_s6 = int_to_ptr.vmem [resolvable:$true] %s148_s6 }
  0x14   : > { %s879_s8 = scalar_lea.sflag [#allocation3], %s137_s26  ;;  %s679_s9 = scalar_lea.hbm %s869_s4, 1024 }
  0x15   : > { %p680_p0 = scmp.ne.s32.totalorder %s869_s4, %s679_s9  ;;  %p681_p1 = pneg %p873_p13 }
  0x16   : > { %s684_s17 = scalar_lea.hbm %s1029_s0, 2048  ;;  %p685_p4 = scmp.lt.u32.totalorder %s869_s4, %s1029_s0 }
  0x17   : > { %p682_p2 = pnand %p681_p1, %p680_p0  ;;  %p686_p5 = scmp.lt.u32.totalorder %s684_s17, %s679_s9 }
  0x18   : > { %p688_p8 = scmp.lt.u32.totalorder %s679_s9, %s869_s4 }
  0x19   : > { %p683_p3 = pneg %p682_p2  ;;  %p687_p7 = por %p686_p5, %p685_p4 }
  0x1b   : > { %p689_p10 = por %p688_p8, %p687_p7 }
  0x1d   : > { %p690_p9 = pnand %p689_p10, %p683_p3 }
  0x1f   : > { %693 = shalt.err (!%p690_p9)
}
  0x20   : > { %s694_s22 = scalar_lea.vmem %s877_s6, 1024  ;;  %s777_s26 = smov [#allocation2]  }
  0x21   : > { %p695_p0 = scmp.ne.s32.totalorder %s877_s6, %s694_s22  ;;  %s699_s27 = sshll.u32 %s777_s26, 4  ;;  %s700_s27 = int_to_ptr.vmem [resolvable:$false] %s699_s27 }
  0x22   : > { %s701_s28 = scalar_lea.vmem %s700_s27, 2048  ;;  %p702_p11 = scmp.lt.s32.totalorder %s877_s6, %s700_s27 }
  0x23   : > { %p697_p2 = pnand %p695_p0, %p681_p1  ;;  %p703_p4 = scmp.lt.s32.totalorder %s701_s28, %s694_s22 }
  0x25   : > { %p698_p12 = pneg %p697_p2  ;;  %p704_p5 = por %p703_p4, %p702_p11 }
  0x27   : > { %p705_p7 = pnand %p704_p5, %p698_p12 }
  0x29   : > { %708 = shalt.err (!%p705_p7)
}
  0x2a   : > { %s778_s29 = smov 256   ;;  %s779_s30 = smov 16  }
  0x2b   : > { %629 = dma.hbm_to_vmem [thread:$0]  (!%p873_p13), %s869_s4, 1024, %s877_s6, %s879_s8, %s778_s29, %s778_s29, %s779_s30  }
  0x2c   : > { %p579_p9 = scmp.ge.s32.totalorder %s775_s15, 1  ;;  %p156_p1 = scmp.lt.s32.totalorder %s775_s15, 3 }
  0x2e   : > { %p157_p3 = pnand %p579_p9, %p156_p1 }
  0x2f   : > { %s910_s5 = sand.u32 (!%p157_p3), 1, %s767_s13  }
  0x30   : > { %160 = sbr.rel (%p157_p3) target bundleno = 817 (0x331), region = 32  ;;  %s580_s9 = sshll.u32 (!%p157_p3), %s910_s5, 6 }
  0x31   : > { %s163_s10 = scalar_lea.sflag (!%p157_p3), [#allocation3], %s910_s5  ;;  %s166_s11 = scalar_lea.vmem (!%p157_p3), [#allocation2], %s580_s9 }
  0x37   : > { %754 = dma.done.wait (%p849_p6), %s163_s10, 1024  }
  0x38   : > { %756 = vsyncadd (%p849_p6), %s163_s10, 4294966272  ;;  %v920_v0 = vld [vmem:[%s166_s11 + $0x20] sm:$0xff]  ;;  %v922_v1 = vld [vmem:[%s166_s11 + $0x28] sm:$0xff]  ;;  %v780_v19 = vmov 0.0|0.0   ;;  %vm781_vm0 = vmmov 0   ;;  %v782_v23 = vmov 0.0   ;;  %v229_v24 = vlaneseq }
  0x39   : > { %v924_v2 = vld [vmem:[%s166_s11] sm:$0xff]  ;;  %v203_v3 = vadd.f32 %v922_v1, %v920_v0  ;;  %v928_v4 = vld [vmem:[%s166_s11 + $0x8] sm:$0xff]  ;;  %v930_v5 = vld [vmem:[%s166_s11 + $0x30] sm:$0xff]  ;;  %v219_v15 = vmax.f32 %v920_v0, %v922_v1  ;;  %616 = vmatprep.subr.bf16.mxu0 %v780_v19  ;;  %608 = vmatprep.mubr.msk.f32.mxu0 %vm781_vm0, %v782_v23  ;;  %vm240_vm1 = vcmask 130112   ;;  %vm247_vm2 = vcmask 195712   ;;  %s188_s27 = scalar_lea.vmem [#allocation5], %s580_s9 }
  0x3a   : > { %v932_v6 = vld [vmem:[%s166_s11 + $0x38] sm:$0xff]  ;;  %v197_v7 = vadd.f32 %v928_v4, %v924_v2  ;;  %v936_v8 = vld [vmem:[%s166_s11 + $0x10] sm:$0xff]  ;;  %v213_v13 = vmax.f32 %v924_v2, %v928_v4  ;;  %v283_v16 = vld [vmem:[%s1030_s1] sm:$0xff]  ;;  %611 = vmatprep.subr.mxu1 %v782_v23  ;;  %613 = vmatprep.mubr.msk.f32.mxu1 %vm781_vm0, %v782_v23  ;;  %v230_v25 = vand.u32 127, %v229_v24  ;;  %v232_v28 = vshrl.u32 %v229_v24, 7  ;;  %s500_s28 = sshll.u32 %s188_s27, 4  ;;  %s978_s28 = int_to_ptr.vmem [resolvable:$true] %s500_s28 }
  0x3b   : > { %v938_v9 = vld [vmem:[%s166_s11 + $0x18] sm:$0xff]  ;;  %204 = vadd.xlane.f32.xlu1 %v203_v3  ;;  %v206_v10 = vadd.f32 %v932_v6, %v930_v5  ;;  %v222_v14 = vmax.f32 %v930_v5, %v932_v6  ;;  %v284_v17 = vld [vmem:[%s1030_s1 + $0x8] sm:$0xff]  ;;  %v285_v20 = vld [vmem:[%s1030_s1 + $0x10] sm:$0xff]  ;;  %vm254_vm3 = vcmask 261312   ;;  %vm281_vm4 = vcmask 1040384   ;;  %s592_s29 = sshll.u32 %s827_s16, 10 }
  0x3c   : > { %198 = vadd.xlane.f32.xlu0 %v197_v7  ;;  %v200_v11 = vadd.f32 %v938_v9, %v936_v8  ;;  %v216_v12 = vmax.f32 %v936_v8, %v938_v9  ;;  %v617_v18 = vpack.c.bf16 %v284_v17, %v283_v16  ;;  %v286_v21 = vld [vmem:[%s1030_s1 + $0x18] sm:$0xff]  ;;  %v235_v27 = vadd.s32 4294967288, %v230_v25  ;;  %v362_v61 = vld [vmem:[%s1031_s2] sm:$0x3]  ;;  %s983_s10 = scalar_lea.hbm %s1032_s3, %s592_s29  ;;  %s487_s16 = scalar_lea.sflag [#allocation4], %s910_s5 }
  0x3d   : > { %v620_v22 = vpack.c.bf16 %v286_v21, %v285_v20  ;;  %v242_v30 = vadd.s32 4294967280, %v230_v25  ;;  %v233_v33 = vsub.s32 %v230_v25, %v232_v28  ;;  %v249_v35 = vadd.s32 4294967272, %v230_v25  ;;  %s709_s11 = scalar_lea.vmem %s978_s28, 1024  ;;  %p1039_p11 = scmp.ne.s32.totalorder %s1036_s24, 0 }
  0x3e   : > { %618 = vmatpush3.bf16.msra.mxu0 %v617_v18  ;;  %v238_v32 = vsub.s32 %v235_v27, %v232_v28  ;;  %vm287_vm5 = vcmask 261120   ;;  %vm367_vm6 = vcmask 1041408   ;;  %vm363_vm7 = vcmask 15360   ;;  %p710_p6 = scmp.ne.s32.totalorder %s978_s28, %s709_s11  ;;  %s783_s23 = smov [#allocation5]  }
  0x3f   : > { %207 = vadd.xlane.f32.xlu1 %v206_v10  ;;  %619 = vmatprep.subr.bf16.mxu0 %v780_v19  ;;  %v245_v38 = vsub.s32 %v242_v30, %v232_v28  ;;  %v252_v43 = vsub.s32 %v249_v35, %v232_v28  ;;  %v453_v16 = vsub.s32 0, %v232_v28  ;;  %s713_s4 = sshll.u32 %s783_s23, 4  ;;  %s714_s4 = int_to_ptr.vmem [resolvable:$false] %s713_s4 }
  0x40   : > { %201 = vadd.xlane.f32.xlu0 %v200_v11  ;;  %612 = vmatpush3.msk.msra.mxu1 %vm367_vm6, %v362_v61  ;;  %p711_p12 = pnand %p710_p6, %p1039_p11  ;;  %s715_s6 = scalar_lea.vmem %s714_s4, 2048 }
  0x41   : > { %p716_p8 = scmp.lt.s32.totalorder %s978_s28, %s714_s4  ;;  %p717_p10 = scmp.lt.s32.totalorder %s715_s6, %s709_s11 }
  0x42   : > { %621 = vmatpush3.bf16.msra.mxu0 %v620_v22  ;;  %p712_p13 = pneg %p711_p12 }
  0x43   : > { %217 = vmax.xlane.f32.xlu1 %v216_v12  ;;  %p718_p0 = por %p717_p10, %p716_p8 }
  0x44   : > { %214 = vmax.xlane.f32.xlu0 %v213_v13 }
  0x45   : > { %p719_p2 = pnand %p718_p0, %p712_p13 }
  0x47   : > { %223 = vmax.xlane.f32.xlu1 %v222_v14 }
  0x48   : > { %220 = vmax.xlane.f32.xlu0 %v219_v15 }
  0xc8   : > { %v205_v26 = vpop.xlane.xlu1 %204 }
  0xc9   : > { %v199_v29 = vpop.xlane.xlu0 %198  ;;  %v211_v39 = vmul.f32 0.00390625, %v205_v26 }
  0xca   : > { %v209_v34 = vmul.f32 0.00390625, %v199_v29 }
  0xcb   : > { %v246_v49 = vrot.slane %v211_v39, %v245_v38 }
  0xcc   : > { %v208_v31 = vpop.xlane.xlu1 %207  ;;  %v234_v42 = vrot.slane %v209_v34, %v233_v33 }
  0xcd   : > { %v202_v36 = vpop.xlane.xlu0 %201  ;;  %v212_v44 = vmul.f32 0.00390625, %v208_v31 }
  0xce   : > { %v210_v37 = vmul.f32 0.00390625, %v202_v36 }
  0xcf   : > { %v253_v51 = vrot.slane %v212_v44, %v252_v43 }
  0xd0   : > { %v239_v40 = vrot.slane %v210_v37, %v238_v32  ;;  %v218_v41 = vpop.xlane.xlu1 %217 }
  0xd1   : > { %v215_v45 = vpop.xlane.xlu0 %214  ;;  %v268_v47 = vrot.slane %v218_v41, %v238_v32 }
  0xd2   : > { %v241_v46 = vsel %vm240_vm1, %v239_v40, %v234_v42  ;;  %v264_v48 = vrot.slane %v215_v45, %v233_v33 }
  0xd3   : > { %v248_v55 = vsel %vm247_vm2, %v246_v49, %v241_v46 }
  0xd4   : > { %v224_v50 = vpop.xlane.xlu1 %223  ;;  %v269_v56 = vsel %vm240_vm1, %v268_v47, %v264_v48  ;;  %v255_v59 = vsel %vm254_vm3, %v253_v51, %v248_v55 }
  0xd5   : > { %v221_v52 = vpop.xlane.xlu0 %220  ;;  %v278_v53 = vrot.slane %v224_v50, %v252_v43 }
  0xd6   : > { %v273_v54 = vrot.slane %v221_v52, %v245_v38 }
  0xd8   : > { %v274_v57 = vsel %vm247_vm2, %v273_v54, %v269_v56 }
  0xd9   : > { %v279_v58 = vsel %vm254_vm3, %v278_v53, %v274_v57 }
  0xda   : > { %v282_v60 = vsel %vm281_vm4, %v255_v59, %v279_v58 }
  0xdb   : > { %609 = vmatmul.mubr.msk.f32.vlgmr.msra.gmra.mrb[0].mxu0 %vm287_vm5, %v282_v60 }
 0x1ae   : > { %v357_v62 = vpop.f32.mrb[0].mxu0 }
 0x1af   : > { %v361_v63 = vmax.f32 %v357_v62, 0.0  ;;  %v610_v3 = vpop.f32.mrb[1].mxu0 }
 0x1b1   : > { %614 = vmatmul.mubr.msk.f32.vlgmr.msra.gmra.mrb[0].mxu1 %vm363_vm7, %v361_v63 }
 0x284   : > { %v437_v7 = vpop.f32.mrb[0].mxu1 }
 0x285   : > { %v442_v10 = vrot.slane %v437_v7, 1  ;;  %v615_v11 = vpop.f32.mrb[1].mxu1 }
 0x287   : > { %v444_v12 = vadd.f32 %v442_v10, %v437_v7 }
 0x289   : > { %v585_v13 = vmul.f32 -1.442695, %v444_v12 }
 0x28b   : > { %675 = vpow2.f32 %v585_v13 }
 0x295   : > { %v676_v14 = vpop.eup %675 }
 0x296   : > { %v448_v15 = vadd.f32 1.0, %v676_v14 }
 0x298   : > { %677 = vrcp.f32 %v448_v15 }
 0x2a2   : > { %v678_v17 = vpop.eup %677 }
 0x2a3   : > { %v454_v18 = vrot.slane %v678_v17, %v453_v16 }
 0x2a5   : > { %460 = vbcast.lane.b32.xlu1 %v454_v18, 264  ;;  %456 = vbcast.lane.b32.xlu0 %v454_v18, 256 }
 0x2a9   : > { %464 = vbcast.lane.b32.xlu1 %v454_v18, 272 }
 0x2ad   : > { %468 = vbcast.lane.b32.xlu1 %v454_v18, 280 }
 0x317   : > { %v461_v19 = vpop.permute.xlu1 %460  ;;  %v457_v20 = vpop.permute.xlu0 %456 }
 0x318   : > { %v472_v21 = vmul.f32 %v461_v19, %v936_v8  ;;  %v473_v22 = vmul.f32 %v461_v19, %v938_v9  ;;  %v470_v23 = vmul.f32 %v457_v20, %v924_v2  ;;  %v471_v24 = vmul.f32 %v457_v20, %v928_v4 }
 0x31a   : > { %480 = vst [vmem:[%s188_s27 + $0x10] sm:$0xff] %v472_v21  ;;  %481 = vst [vmem:[%s188_s27 + $0x18] sm:$0xff] %v473_v22 }
 0x31b   : > { %478 = vst [vmem:[%s188_s27] sm:$0xff] %v470_v23  ;;  %479 = vst [vmem:[%s188_s27 + $0x8] sm:$0xff] %v471_v24  ;;  %v465_v25 = vpop.permute.xlu1 %464 }
 0x31c   : > { %v474_v26 = vmul.f32 %v465_v25, %v920_v0  ;;  %v475_v8 = vmul.f32 %v465_v25, %v922_v1 }
 0x31e   : > { %482 = vst [vmem:[%s188_s27 + $0x20] sm:$0xff] %v474_v26  ;;  %483 = vst [vmem:[%s188_s27 + $0x28] sm:$0xff] %v475_v8 }
 0x31f   : > { %v469_v2 = vpop.permute.xlu1 %468 }
 0x320   : > { %v476_v4 = vmul.f32 %v469_v2, %v930_v5  ;;  %v477_v0 = vmul.f32 %v469_v2, %v932_v6 }
 0x322   : > { %484 = vst [vmem:[%s188_s27 + $0x30] sm:$0xff] %v476_v4  ;;  %485 = vst [vmem:[%s188_s27 + $0x38] sm:$0xff] %v477_v0 }
 0x323   : > { %722 = shalt.err (!%p719_p2)
}
 0x324   : > { %s723_s7 = scalar_lea.hbm %s983_s10, 1024  ;;  %s727_s19 = scalar_lea.hbm %s1032_s3, 2048 }
 0x325   : > { %p724_p4 = scmp.ne.s32.totalorder %s983_s10, %s723_s7  ;;  %p728_p9 = scmp.lt.u32.totalorder %s983_s10, %s1032_s3 }
 0x326   : > { %p729_p1 = scmp.lt.u32.totalorder %s727_s19, %s723_s7  ;;  %p731_p6 = scmp.lt.u32.totalorder %s723_s7, %s983_s10 }
 0x327   : > { %p725_p5 = pnand %p724_p4, %p1039_p11 }
 0x328   : > { %p730_p3 = por %p729_p1, %p728_p9 }
 0x329   : > { %p726_p7 = pneg %p725_p5 }
 0x32a   : > { %p732_p12 = por %p731_p6, %p730_p3 }
 0x32c   : > { %p733_p13 = pnand %p732_p12, %p726_p7 }
 0x32e   : > { %736 = shalt.err (!%p733_p13)
}
 0x32f   : > { %s784_s26 = smov 256   ;;  %s785_s27 = smov 16  }
 0x330   : > { %624 = dma.vmem_to_hbm [thread:$0]  (%p1039_p11), %s978_s28, 1024, %s983_s10, %s487_s16, %s784_s26, %s784_s26, %s785_s27  }
 0x331 PF: > { %s515_s29 = sand.u32 1, %s763_s12   ;;  %p1040_p8 = scmp.ne.s32.totalorder %s1037_s25, 0 }
 0x332   : > { %p1041_p10 = scmp.ge.s32.totalorder %s775_s15, 2  ;;  %s516_s30 = scalar_lea.sflag [#allocation4], %s515_s29 }
 0x334   : > { %p631_p0 = pnand %p1041_p10, %p1040_p8 }
 0x336   : > { %758 = dma.done.wait (!%p631_p0), %s516_s30, 1024  }
 0x337   : > { %760 = vsyncadd (!%p631_p0), %s516_s30, 4294966272  ;;  %p16_p2 = scmp.ge.s32.totalorder %s831_s18, 4   ;;  %s1042_s12 = smov %s767_s13 }
 0x338   : > { %s1043_s13 = smov %s771_s14  ;;  %s1044_s14 = smov %s843_s21 }
 0x339   : > { %s1045_s15 = smov %s831_s18  ;;  %18 = sbr.rel (!%p16_p2) target bundleno = 5 (0x5), region = 77 }
 0x340   :  { %521 = vsyncpa [#allocation3], 1 }
 0x341   :  { %523 = vsyncpa [#allocation3 + $0x1], 1 }
 0x342   :  { %524 = vsyncpa [#allocation4], 1 }
 0x343   :  { %526 = vsyncpa [#allocation4 + $0x1], 1 }

</bundles_post_ra>
